<compile_context>
chip_gen: v7x
topology: tpu7x:2x2x1
jax: 0.10.0
libtpu: 0.0.40
codegen_flags: <defaults>
</compile_context>

<pallas_src>
import jax
import jax.numpy as jnp
from jax.experimental import pallas as pl
from jax.experimental.pallas import tpu as pltpu


# ---------------------------------------------------------------------------
# Pass 1: hoisted input projection  Gx = X @ W_ih^T + (b_ih + b_hh)
# ---------------------------------------------------------------------------
def _input_proj_kernel(x_ref, w_ref, b_ref, gx_ref):
    gx_ref[...] = (
        jnp.dot(x_ref[...], w_ref[...], preferred_element_type=jnp.float32)
        + b_ref[...]
    )


def _input_projection(x2d, w_ih_t, b_row, *, block_rows=256):
    rows, in_dim = x2d.shape
    gate_dim = w_ih_t.shape[1]
    if rows % block_rows != 0:
        block_rows = rows  # small problems: single row block
    grid = (rows // block_rows,)
    return pl.pallas_call(
        _input_proj_kernel,
        out_shape=jax.ShapeDtypeStruct((rows, gate_dim), jnp.float32),
        grid_spec=pltpu.PrefetchScalarGridSpec(
            num_scalar_prefetch=0,
            grid=grid,
            in_specs=[
                pl.BlockSpec((block_rows, in_dim), lambda r: (r, 0)),
                pl.BlockSpec((in_dim, gate_dim), lambda r: (0, 0)),
                pl.BlockSpec((1, gate_dim), lambda r: (0, 0)),
            ],
            out_specs=pl.BlockSpec((block_rows, gate_dim), lambda r: (r, 0)),
        ),
        compiler_params=pltpu.CompilerParams(
            dimension_semantics=("parallel",),
            vmem_limit_bytes=32 * 1024 * 1024,
        ),
    )(x2d, w_ih_t, b_row)


# ---------------------------------------------------------------------------
# Pass 2: the LSTM recurrence + fused final Linear on h_T
# ---------------------------------------------------------------------------
def _lstm_recurrence_kernel(gx_ref, w_hh_ref, w_reg_ref, b_reg_ref,
                            y_ref, h_scr, c_scr):
    t_blk = gx_ref.shape[0]
    hidden = h_scr.shape[-1]
    t_id = pl.program_id(1)  # time-block index (sequential, "arbitrary")

    @pl.when(t_id == 0)
    def _init():
        h_scr[...] = jnp.zeros_like(h_scr)
        c_scr[...] = jnp.zeros_like(c_scr)

    w_hh = w_hh_ref[...]  # (H, 4H), VMEM-resident across the whole grid

    def step(i, carry):
        h, c = carry
        # Only the sequential part remains per step: the x projection (Gx) was
        # hoisted into pass 1, so there is a single MXU push per timestep.
        gates = gx_ref[i] + jnp.dot(h, w_hh, preferred_element_type=jnp.float32)
        i_g = jax.nn.sigmoid(gates[:, 0 * hidden:1 * hidden])
        f_g = jax.nn.sigmoid(gates[:, 1 * hidden:2 * hidden])
        g_g = jnp.tanh(gates[:, 2 * hidden:3 * hidden])
        o_g = jax.nn.sigmoid(gates[:, 3 * hidden:4 * hidden])
        c_new = f_g * c + i_g * g_g
        h_new = o_g * jnp.tanh(c_new)
        return h_new, c_new

    # Unrolled time loop inside the block: gives the scheduler a big window and
    # removes per-step grid overhead.
    h_t, c_t = jax.lax.fori_loop(
        0, t_blk, step, (h_scr[...], c_scr[...]), unroll=True)
    h_scr[...] = h_t
    c_scr[...] = c_t

    @pl.when(t_id == pl.num_programs(1) - 1)
    def _finalize():
        # output_size is tiny (1): VPU multiply + lane reduction instead of an
        # MXU dot whose N dimension would be almost entirely wasted.
        w_reg = w_reg_ref[...]                                   # (O, H)
        y = jnp.sum(h_t[:, None, :] * w_reg[None, :, :], axis=-1)  # (B_blk, O)
        y = y + b_reg_ref[...]
        y_ref[0] = y.astype(y_ref.dtype)


def _pick_time_block(seq_len, max_block=32):
    for cand in range(min(seq_len, max_block), 0, -1):
        if seq_len % cand == 0:
            return cand
    return 1


def lstm_classifier(data, w_ih, w_hh, b_ih, b_hh, w_reg, b_reg,
                    *, batch_block=None, max_time_block=32):
    """data: (S, B, I) float32 (time-major, like nn.LSTM batch_first=False).
       Weights follow PyTorch nn.LSTM / nn.Linear shapes:
         w_ih (4H, I), w_hh (4H, H), b_ih/b_hh (4H,), w_reg (O, H), b_reg (O,).
       Returns (num_layers=1, B, O), matching LSTMClassier.forward."""
    S, B, I = data.shape
    H = w_hh.shape[1]
    O = w_reg.shape[0]

    data = jnp.asarray(data, jnp.float32)
    w_ih_t = jnp.asarray(w_ih, jnp.float32).T                       # (I, 4H)
    w_hh_t = jnp.asarray(w_hh, jnp.float32).T                       # (H, 4H)
    b_sum = (jnp.asarray(b_ih, jnp.float32)
             + jnp.asarray(b_hh, jnp.float32)).reshape(1, 4 * H)
    w_reg2 = jnp.asarray(w_reg, jnp.float32).reshape(O, H)
    b_reg2 = jnp.asarray(b_reg, jnp.float32).reshape(1, O)

    # ---- Pass 1: one large matmul for all timesteps (MXU-friendly).
    gx = _input_projection(data.reshape(S * B, I), w_ih_t, b_sum)
    gx = gx.reshape(S, B, 4 * H)

    # ---- Pass 2: recurrence, T_blk timesteps per grid step.
    t_blk = _pick_time_block(S, max_time_block)
    n_time = S // t_blk

    # Optional batch tiling: on v7x (2 TensorCores) pass e.g. batch_block=B//2
    # (a multiple of 8) so the "parallel" batch axis shards across cores.
    if (batch_block is None or B % batch_block != 0
            or (batch_block != B and batch_block % 8 != 0)):
        batch_block = B
    n_batch = B // batch_block

    out = pl.pallas_call(
        _lstm_recurrence_kernel,
        out_shape=jax.ShapeDtypeStruct((1, B, O), jnp.float32),
        grid_spec=pltpu.PrefetchScalarGridSpec(
            num_scalar_prefetch=0,
            grid=(n_batch, n_time),
            in_specs=[
                pl.BlockSpec((t_blk, batch_block, 4 * H),
                             lambda b, t: (t, b, 0)),               # Gx slab
                pl.BlockSpec((H, 4 * H), lambda b, t: (0, 0)),      # W_hh^T
                pl.BlockSpec((O, H), lambda b, t: (0, 0)),          # W_reg
                pl.BlockSpec((1, O), lambda b, t: (0, 0)),          # b_reg
            ],
            out_specs=pl.BlockSpec((1, batch_block, O),
                                   lambda b, t: (0, b, 0)),
            scratch_shapes=[
                pltpu.VMEM((batch_block, H), jnp.float32),          # h state
                pltpu.VMEM((batch_block, H), jnp.float32),          # c state
            ],
        ),
        compiler_params=pltpu.CompilerParams(
            # Batch tiles are independent ("parallel"); time carries the
            # recurrence ("arbitrary").
            dimension_semantics=("parallel", "arbitrary"),
            vmem_limit_bytes=32 * 1024 * 1024,
        ),
    )(gx, w_hh_t, w_reg2, b_reg2)
    return out  # (num_layers=1, B, O)


def lstm_classifier_ref(data, w_ih, w_hh, b_ih, b_hh, w_reg, b_reg):
    """Pure-JAX reference (lax.scan) matching PyTorch nn.LSTM semantics."""
    S, B, I = data.shape
    H = w_hh.shape[1]
    h0 = jnp.zeros((B, H), jnp.float32)
    c0 = jnp.zeros((B, H), jnp.float32)

    def step(carry, x_t):
        h, c = carry
        gates = x_t @ w_ih.T + b_ih + h @ w_hh.T + b_hh
        i_g = jax.nn.sigmoid(gates[:, 0 * H:1 * H])
        f_g = jax.nn.sigmoid(gates[:, 1 * H:2 * H])
        g_g = jnp.tanh(gates[:, 2 * H:3 * H])
        o_g = jax.nn.sigmoid(gates[:, 3 * H:4 * H])
        c_new = f_g * c + i_g * g_g
        h_new = o_g * jnp.tanh(c_new)
        return (h_new, c_new), None

    (h_T, _), _ = jax.lax.scan(step, (h0, c0), data)
    y = h_T @ w_reg.T + b_reg
    return y[None, :, :]


if __name__ == "__main__":
    # Small shapes consistent with the module's forward:
    # data: (seq, batch, input_size); hidden_size=32; output_size=1; num_layers=1.
    S, B, I, H, O = 8, 2, 16, 32, 1

    key = jax.random.PRNGKey(0)
    ks = jax.random.split(key, 7)
    scale = 1.0 / jnp.sqrt(H)
    data = jax.random.normal(ks[0], (S, B, I), jnp.float32)
    w_ih = scale * jax.random.normal(ks[1], (4 * H, I), jnp.float32)
    w_hh = scale * jax.random.normal(ks[2], (4 * H, H), jnp.float32)
    b_ih = scale * jax.random.normal(ks[3], (4 * H,), jnp.float32)
    b_hh = scale * jax.random.normal(ks[4], (4 * H,), jnp.float32)
    w_reg = scale * jax.random.normal(ks[5], (O, H), jnp.float32)
    b_reg = scale * jax.random.normal(ks[6], (O,), jnp.float32)

    y = lstm_classifier(data, w_ih, w_hh, b_ih, b_hh, w_reg, b_reg)
    y = jax.block_until_ready(y)

    y_ref = lstm_classifier_ref(data, w_ih, w_hh, b_ih, b_hh, w_reg, b_reg)
    assert y.shape == (1, B, O), y.shape
    assert jnp.allclose(y, y_ref, atol=1e-4, rtol=1e-4), (y, y_ref)

    print("KERNEL_OK")
</pallas_src>

<mosaic_0001>
module attributes {stable_mosaic.version = 11 : i64} {
  func.func @_input_proj_kernel(%arg0: i32, %arg1: memref<16x16xf32, #tpu.memory_space<vmem>>, %arg2: memref<16x128xf32, #tpu.memory_space<vmem>>, %arg3: memref<1x128xf32, #tpu.memory_space<vmem>>, %arg4: memref<16x128xf32, #tpu.memory_space<vmem>>) attributes {dimension_semantics = [#tpu.dimension_semantics<parallel>], iteration_bounds = array<i64: 1>, scalar_prefetch = 0 : i64, scratch_operands = 0 : i64, tpu.core_type = #tpu.core_type<tc>, window_params = [{transform_indices = @transform_0, window_bounds = array<i64: 16, 16>}, {pipeline_mode = #tpu.pipeline_mode<synchronous>, transform_indices = @transform_1, window_bounds = array<i64: 16, 128>}, {pipeline_mode = #tpu.pipeline_mode<synchronous>, transform_indices = @transform_2, window_bounds = array<i64: 1, 128>}, {transform_indices = @transform_3, window_bounds = array<i64: 16, 128>}]} {
    %c0 = arith.constant 0 : index
    %c0_0 = arith.constant 0 : index
    %0 = vector.load %arg1[%c0, %c0_0] : memref<16x16xf32, #tpu.memory_space<vmem>>, vector<16x16xf32>
    %c0_1 = arith.constant 0 : index
    %c0_2 = arith.constant 0 : index
    %1 = vector.load %arg2[%c0_1, %c0_2] : memref<16x128xf32, #tpu.memory_space<vmem>>, vector<16x128xf32>
    %cst = arith.constant dense<0.000000e+00> : vector<16x128xf32>
    %2 = tpu.matmul %0, %1, %cst {dimension_numbers = #tpu.dot_dimension_numbers<[1], [0], [0], [1], [0, 0, 1, 1], [], []>} : vector<16x16xf32>, vector<16x128xf32>, vector<16x128xf32> -> vector<16x128xf32>
    %c0_3 = arith.constant 0 : index
    %c0_4 = arith.constant 0 : index
    %3 = vector.load %arg3[%c0_3, %c0_4] : memref<1x128xf32, #tpu.memory_space<vmem>>, vector<1x128xf32>
    %4 = vector.broadcast %3 : vector<1x128xf32> to vector<16x128xf32>
    %5 = arith.addf %2, %4 : vector<16x128xf32>
    %c0_5 = arith.constant 0 : index
    %c0_6 = arith.constant 0 : index
    %6 = vector.load %arg4[%c0_5, %c0_6] : memref<16x128xf32, #tpu.memory_space<vmem>>, vector<16x128xf32>
    tpu.vector_store %arg4[%c0_5, %c0_6], %5 {strides = array<i32>} : memref<16x128xf32, #tpu.memory_space<vmem>>, vector<16x128xf32>,
    return
  }
  func.func @transform_0(%arg0: i32) -> (i32, i32) {
    %c0_i32 = arith.constant 0 : i32
    %c0_i32_0 = arith.constant 0 : i32
    return %arg0, %c0_i32 : i32, i32
  }
  func.func @transform_1(%arg0: i32) -> (i32, i32) {
    %c0_i32 = arith.constant 0 : i32
    %c0_i32_0 = arith.constant 0 : i32
    %c0_i32_1 = arith.constant 0 : i32
    return %c0_i32, %c0_i32_0 : i32, i32
  }
  func.func @transform_2(%arg0: i32) -> (i32, i32) {
    %c0_i32 = arith.constant 0 : i32
    %c0_i32_0 = arith.constant 0 : i32
    %c0_i32_1 = arith.constant 0 : i32
    return %c0_i32, %c0_i32_0 : i32, i32
  }
  func.func @transform_3(%arg0: i32) -> (i32, i32) {
    %c0_i32 = arith.constant 0 : i32
    %c0_i32_0 = arith.constant 0 : i32
    return %arg0, %c0_i32 : i32, i32
  }
}

</mosaic_0001>

<bundles_post_ra>
// kernel: tpu_custom_call.1
= control target key start
LH: loop header
LB: loop body
LE: loop exit
PB: predicated region body
PF: predicated region fallthrough
CT: control target
= control target key end

     0   :  { %8 = vsyncpa [#allocation3], 0  ;;  %s324_s0 = inlined_call_operand.hbm [shape: f32[16,16], index: 0, kind: input, shape index: {}]   ;;  %s325_s1 = inlined_call_operand.hbm [shape: f32[16,128], index: 1, kind: input, shape index: {}]   ;;  %s326_s2 = inlined_call_operand.vmem [shape: f32[1,128], index: 2, kind: input, shape index: {}]   ;;  %s327_s3 = inlined_call_operand.hbm [shape: f32[16,128], index: 3, kind: output, shape index: {}]  }
   0x1   :  { %9 = vsyncpa [#allocation6], 0 }
   0x2   :  { %10 = vsyncpa [#allocation4], 0  ;;  %s251_s12 = smov [#allocation2]   ;;  %s179_s16 = scalar_lea.hbm %s324_s0, 256 }
   0x3   :  { %s16_s13 = sshll.u32 %s251_s12, 4  ;;  %p180_p0 = scmp.ne.s32.totalorder %s324_s0, %s179_s16  ;;  %s17_s13 = int_to_ptr.vmem [resolvable:$true] %s16_s13 }
   0x4   :  { %p183_p1 = scmp.lt.u32.totalorder %s179_s16, %s324_s0 }
   0x6   :  { %p185_p2 = pnand %p183_p1, %p180_p0 }
   0x8   :  { %188 = shalt.err (!%p185_p2)
}
   0x9   :  { %s189_s21 = scalar_lea.vmem %s17_s13, 256  ;;  %p194_p4 = scmp.lt.s32.totalorder %s17_s13, %s17_s13 }
   0xa   :  { %p190_p3 = scmp.ne.s32.totalorder %s17_s13, %s189_s21  ;;  %p195_p5 = scmp.lt.s32.totalorder %s189_s21, %s189_s21 }
   0xc   :  { %p196_p6 = por %p195_p5, %p194_p4 }
   0xe   :  { %p197_p7 = pnand %p196_p6, %p190_p3 }
  0x10   :  { %200 = shalt.err (!%p197_p7)
}
  0x11   :  { %s252_s22 = smov 128   ;;  %s253_s23 = smov 8  }
  0x12   :  { %22 = dma.hbm_to_vmem [thread:$0]  %s324_s0, 256, %s17_s13, [#allocation3], %s252_s22, %s252_s22, %s253_s23  }
  0x13   :  { %s254_s26 = smov [#allocation5]   ;;  %s201_s30 = scalar_lea.hbm %s325_s1, 256 }
  0x14   :  { %s28_s27 = sshll.u32 %s254_s26, 4  ;;  %p202_p8 = scmp.ne.s32.totalorder %s325_s1, %s201_s30  ;;  %s29_s27 = int_to_ptr.vmem [resolvable:$true] %s28_s27 }
  0x15   :  { %p205_p9 = scmp.lt.u32.totalorder %s201_s30, %s325_s1 }
  0x17   :  { %p207_p10 = pnand %p205_p9, %p202_p8 }
  0x19   :  { %210 = shalt.err (!%p207_p10)
}
  0x1a   :  { %s211_s8 = scalar_lea.vmem %s29_s27, 256  ;;  %p216_p12 = scmp.lt.s32.totalorder %s29_s27, %s29_s27 }
  0x1b   :  { %p212_p11 = scmp.ne.s32.totalorder %s29_s27, %s211_s8  ;;  %p217_p13 = scmp.lt.s32.totalorder %s211_s8, %s211_s8 }
  0x1d   :  { %p218_p0 = por %p217_p13, %p216_p12 }
  0x1f   :  { %p219_p1 = pnand %p218_p0, %p212_p11 }
  0x21   :  { %222 = shalt.err (!%p219_p1)
}
  0x22   :  { %34 = dma.hbm_to_vmem [thread:$0]  %s325_s1, 256, %s29_s27, [#allocation6], %s252_s22, %s252_s22, %s253_s23  }
  0x23   :  { %245 = dma.done.wait [#allocation3], 256  }
  0x24   :  { %246 = vsyncadd [#allocation3], 4294967040 }
  0x25   :  { %247 = dma.done.wait [#allocation6], 256  }
  0x26   :  { %248 = vsyncadd [#allocation6], 4294967040  ;;  %vm54_vm0 = vcmask 130048   ;;  %v45_v0 = vld [vmem:[#allocation5] sm:$0xff]  ;;  %v46_v1 = vld [vmem:[#allocation5 + $0x8] sm:$0xff]  ;;  %s255_s12 = smov [#allocation7]  }
  0x27   :  { %v43_v2 = vld [vmem:[#allocation2] sm:$0xff]  ;;  %v170_v3 = vpack.c.bf16 %v46_v1, %v45_v0  ;;  %v44_v4 = vld [vmem:[#allocation2 + $0x8] sm:$0xff]  ;;  %s143_s1 = sshll.u32 %s255_s12, 4  ;;  %s144_s1 = int_to_ptr.vmem [resolvable:$true] %s143_s1 }
  0x28   :  { %167 = vmatprep.mubr.msk.f32.mxu0 %vm54_vm0, %v43_v2  ;;  %v156_v5 = vld [vmem:[%s326_s2] ss:$0 sm:$0xff]  ;;  %s223_s13 = scalar_lea.vmem %s144_s1, 256  ;;  %p228_p3 = scmp.lt.s32.totalorder %s144_s1, %s144_s1 }
  0x29   :  { %171 = vmatprep.subr.bf16.mxu0 %v170_v3  ;;  %p224_p2 = scmp.ne.s32.totalorder %s144_s1, %s223_s13  ;;  %p229_p4 = scmp.lt.s32.totalorder %s223_s13, %s223_s13 }
  0x2a   :  { %173 = vmatpush3.bf16.msra.mxu0 %v170_v3 }
  0x2b   :  { %p230_p5 = por %p229_p4, %p228_p3 }
  0x2d   :  { %168 = vmatmul.mubr.msk.f32.vlgmr.msra.gmra.mrb[0].mxu0 %vm54_vm0, %v44_v4  ;;  %p231_p6 = pnand %p230_p5, %p224_p2 }
 0x100   :  { %v169_v6 = vpop.f32.mrb[0].mxu0 }
 0x101   :  { %v133_v7 = vadd.f32 %v169_v6, %v156_v5  ;;  %v127_v8 = vpop.f32.mrb[1].mxu0 }
 0x102   :  { %v128_v9 = vadd.f32 %v156_v5, %v127_v8 }
 0x103   :  { %137 = vst [vmem:[#allocation7 + $0x8] sm:$0xff] %v133_v7 }
 0x104   :  { %136 = vst [vmem:[#allocation7] sm:$0xff] %v128_v9 }
 0x105   :  { %234 = shalt.err (!%p231_p6)
}
 0x106   :  { %s235_s2 = scalar_lea.hbm %s327_s3, 256 }
 0x107   :  { %p236_p7 = scmp.ne.s32.totalorder %s327_s3, %s235_s2  ;;  %p239_p8 = scmp.lt.u32.totalorder %s235_s2, %s327_s3 }
 0x109   :  { %p241_p9 = pnand %p239_p8, %p236_p7 }
 0x10b   :  { %244 = shalt.err (!%p241_p9)
}
 0x10c   :  { %149 = dma.vmem_to_hbm [thread:$0]  %s144_s1, 256, %s327_s3, [#allocation4], %s252_s22, %s252_s22, %s253_s23  }
 0x10d   :  { %249 = dma.done.wait [#allocation4], 256  }
 0x10e   :  { %250 = vsyncadd [#allocation4], 4294967040 }
 0x10f   :  { %153 = vsyncpa [#allocation3], 1 }
 0x110   :  { %154 = vsyncpa [#allocation6], 1 }
 0x111   :  { %155 = vsyncpa [#allocation4], 1 }

</bundles_post_ra>
